<compile_context>
chip_gen: v6e
topology: v6e:2x2x1
jax: 0.10.0
libtpu: 0.0.40
codegen_flags: <defaults>
</compile_context>

<pallas_src>
import functools

import jax
import jax.numpy as jnp
from jax.experimental import pallas as pl
from jax.experimental.pallas import tpu as pltpu


def _round_up(x, m):
    return ((x + m - 1) // m) * m


def _packed_onehot(idx_pair, num_rows, dtype):
    """idx_pair: (TR, 2) int32, column 1 already offset by num_cast.

    Returns a (TR, num_rows) matrix with (at most) two ones per row selecting
    the packed-table rows for the two tokens packed into this output row.
    """
    tr = idx_pair.shape[0]
    iota = jax.lax.broadcasted_iota(jnp.int32, (tr, num_rows), 1)
    hit = (iota == idx_pair[:, 0:1]) | (iota == idx_pair[:, 1:2])
    return hit.astype(dtype)


def movie_phi_gather_kernel(idx_ref, tbl_ref, out_ref):
    # Pure gather of the precomputed per-cast output table (2 tokens packed per
    # 128-lane row) expressed as a tiny one-hot matmul on the MXU.
    onehot = _packed_onehot(idx_ref[...], tbl_ref.shape[0], tbl_ref.dtype)
    out_ref[...] = jnp.dot(onehot, tbl_ref[...],
                           preferred_element_type=jnp.float32)


def movie_phi_fused_kernel(idx_ref, emb_ref, w1_ref, b1_ref, w2_ref, b2_ref,
                           out_ref, *, tanh_dtype):
    # Generic fallback: gather tanh(emb) (first tanh hoisted to the wrapper),
    # then two packed (2D x 2D) matmuls + tanh, all lane-dense (width 2*D).
    mm_dtype = w1_ref.dtype
    onehot = _packed_onehot(idx_ref[...], emb_ref.shape[0], emb_ref.dtype)
    e = jnp.dot(onehot, emb_ref[...], preferred_element_type=jnp.float32)
    a1 = jnp.dot(e.astype(mm_dtype), w1_ref[...],
                 preferred_element_type=jnp.float32) + b1_ref[...]
    h = jnp.tanh(a1.astype(tanh_dtype))
    a2 = jnp.dot(h.astype(mm_dtype), w2_ref[...],
                 preferred_element_type=jnp.float32) + b2_ref[...]
    out_ref[...] = jnp.tanh(a2.astype(tanh_dtype)).astype(out_ref.dtype)


def _pack_pair_cols(m):
    # (R, D) -> (2R, 2D) block-diagonal [[m, 0], [0, m]]: slot 0 uses lanes
    # [0, D), slot 1 uses lanes [D, 2D).
    z = jnp.zeros_like(m)
    top = jnp.concatenate([m, z], axis=1)
    bot = jnp.concatenate([z, m], axis=1)
    return jnp.concatenate([top, bot], axis=0)


def movie_phi_forward(x_idx, emb_table, w1, b1, w2, b2, *,
                      precompute_table=None, param_dtype=jnp.float32,
                      tanh_dtype=jnp.float32, tile_tokens=4096):
    """x_idx: int indices of shape (batch, seq). Returns (batch, seq, D) f32.

    w1/w2 are stored input-major (in, out) so `x @ w` matches PyTorch's
    `x @ weight.T`.  param_dtype=bfloat16 is safe on all generations (f32
    accumulation); tanh_dtype=bfloat16 is a v6e/v7x option (keep f32 on v5e).
    """
    batch, seq = x_idx.shape
    num_cast, d = emb_table.shape
    n = batch * seq

    if precompute_table is None:
        precompute_table = num_cast <= 1024

    # ---- token tiling: 2 tokens per 2*d(=128)-lane output row --------------
    rows = (n + 1) // 2
    rows_min = _round_up(max(rows, 1), 8)
    tile_rows = max(8, _round_up(min(tile_tokens // 2, rows_min), 8))
    # Keep >= 2 grid steps when there is enough work so the "parallel" grid
    # axis can be sharded across v7x's two TensorCores.
    if rows_min >= 16 and tile_rows >= rows_min:
        tile_rows = _round_up(rows_min // 2, 8)
    rows_pad = _round_up(rows_min, tile_rows)
    grid_len = rows_pad // tile_rows

    # ---- indices: (rows_pad, 2) int32, column 1 pre-offset by num_cast -----
    idx = x_idx.reshape(-1).astype(jnp.int32)
    idx = jnp.pad(idx, (0, 2 * rows_pad - n))
    idx = idx.reshape(rows_pad, 2) + jnp.array([0, num_cast], jnp.int32)

    vmem = pl.BlockSpec(memory_space=pltpu.MemorySpace.VMEM)
    idx_spec = pl.BlockSpec((tile_rows, 2), lambda i: (i, 0))
    out_spec = pl.BlockSpec((tile_rows, 2 * d), lambda i: (i, 0))
    out_shape = jax.ShapeDtypeStruct((rows_pad, 2 * d), jnp.float32)
    cparams = pltpu.CompilerParams(dimension_semantics=("parallel",))

    if precompute_table:
        # Fold the whole network into one (num_cast, d) table (f32, exact) in
        # the wrapper; the kernel is a pure lane-dense gather.
        tbl = jnp.tanh(jnp.tanh(jnp.tanh(emb_table) @ w1 + b1) @ w2 + b2)
        tbl = _pack_pair_cols(tbl.astype(jnp.float32))  # (2C, 2D) f32
        cost = pl.CostEstimate(
            flops=2 * rows_pad * (2 * num_cast) * (2 * d),
            transcendentals=0,
            bytes_accessed=idx.size * 4 + tbl.size * 4 + rows_pad * 2 * d * 4,
        )
        out = pl.pallas_call(
            movie_phi_gather_kernel,
            out_shape=out_shape,
            grid=(grid_len,),
            in_specs=[idx_spec, vmem],
            out_specs=out_spec,
            compiler_params=cparams,
            cost_estimate=cost,
        )(idx, tbl)
    else:
        # Generic fused path.  First tanh hoisted onto the table (exact); the
        # tanh(emb) table and biases stay f32 (VMEM-resident, tiny), only the
        # matmul weights take param_dtype.
        emb_p = _pack_pair_cols(jnp.tanh(emb_table).astype(jnp.float32))
        w1_p = _pack_pair_cols(w1.astype(param_dtype))
        w2_p = _pack_pair_cols(w2.astype(param_dtype))
        b1_p = jnp.concatenate([b1, b1]).reshape(1, 2 * d).astype(jnp.float32)
        b2_p = jnp.concatenate([b2, b2]).reshape(1, 2 * d).astype(jnp.float32)
        pbytes = jnp.dtype(param_dtype).itemsize
        cost = pl.CostEstimate(
            flops=2 * rows_pad * ((2 * num_cast) * (2 * d) + 2 * (2 * d) ** 2),
            transcendentals=2 * rows_pad * 2 * d,
            bytes_accessed=(idx.size * 4 + emb_p.size * 4
                            + (w1_p.size + w2_p.size) * pbytes
                            + (b1_p.size + b2_p.size) * 4
                            + rows_pad * 2 * d * 4),
        )
        kern = functools.partial(movie_phi_fused_kernel, tanh_dtype=tanh_dtype)
        out = pl.pallas_call(
            kern,
            out_shape=out_shape,
            grid=(grid_len,),
            in_specs=[idx_spec, vmem, vmem, vmem, vmem, vmem],
            out_specs=out_spec,
            compiler_params=cparams,
            cost_estimate=cost,
        )(idx, emb_p, w1_p, b1_p, w2_p, b2_p)

    # Row r holds tokens (2r, 2r+1) back-to-back -> free row-major reshape.
    return out.reshape(2 * rows_pad, d)[:n].reshape(batch, seq, d)


def movie_phi_reference(x_idx, emb_table, w1, b1, w2, b2):
    e = jnp.take(emb_table, x_idx, axis=0)
    h = jnp.tanh(e)
    h = jnp.tanh(h @ w1 + b1)
    return jnp.tanh(h @ w2 + b2)


if __name__ == "__main__":
    num_cast = 16
    output_dim = 64
    batch, seq = 2, 8

    key = jax.random.PRNGKey(0)
    k_emb, k_w1, k_b1, k_w2, k_b2, k_x, k_x2 = jax.random.split(key, 7)

    # Deterministic synthetic parameters (shapes match nn.Embedding / nn.Linear).
    emb_table = jax.random.normal(k_emb, (num_cast, output_dim), jnp.float32)
    # Stored input-major (in, out): x @ w == PyTorch x @ weight.T
    w1 = jax.random.normal(k_w1, (output_dim, output_dim), jnp.float32) * 0.1
    b1 = jax.random.normal(k_b1, (output_dim,), jnp.float32) * 0.1
    w2 = jax.random.normal(k_w2, (output_dim, output_dim), jnp.float32) * 0.1
    b2 = jax.random.normal(k_b2, (output_dim,), jnp.float32) * 0.1

    x = jax.random.randint(k_x, (batch, seq), 0, num_cast, jnp.int32)
    ref = movie_phi_reference(x, emb_table, w1, b1, w2, b2)

    # Default path: precomputed per-cast output table, pure lane-dense gather.
    out = jax.block_until_ready(movie_phi_forward(x, emb_table, w1, b1, w2, b2))
    assert out.shape == (batch, seq, output_dim)
    assert jnp.allclose(out, ref, atol=1e-5, rtol=1e-5), "table-gather mismatch"

    # Generic fused fallback (large num_cast), f32 — exact vs reference.
    out_g = jax.block_until_ready(
        movie_phi_forward(x, emb_table, w1, b1, w2, b2, precompute_table=False))
    assert jnp.allclose(out_g, ref, atol=1e-5, rtol=1e-5), "fused f32 mismatch"

    # Generic fused fallback with bf16 weights + bf16 tanh (v6e/v7x option).
    out_bf16 = jax.block_until_ready(
        movie_phi_forward(x, emb_table, w1, b1, w2, b2, precompute_table=False,
                          param_dtype=jnp.bfloat16, tanh_dtype=jnp.bfloat16))
    assert jnp.allclose(out_bf16, ref, atol=3e-2, rtol=3e-2), "fused bf16 mismatch"

    # Larger odd-sized batch: exercises padding and a multi-step parallel grid.
    x_big = jax.random.randint(k_x2, (5, 201), 0, num_cast, jnp.int32)
    ref_big = movie_phi_reference(x_big, emb_table, w1, b1, w2, b2)
    out_big = jax.block_until_ready(
        movie_phi_forward(x_big, emb_table, w1, b1, w2, b2))
    assert out_big.shape == (5, 201, output_dim)
    assert jnp.allclose(out_big, ref_big, atol=1e-5, rtol=1e-5), "big-batch mismatch"

    print("KERNEL_OK")
</pallas_src>

<mosaic_0001>
module attributes {stable_mosaic.version = 11 : i64} {
  func.func @movie_phi_gather_kernel(%arg0: i32, %arg1: memref<8x2xi32, #tpu.memory_space<vmem>>, %arg2: memref<32x128xf32, #tpu.memory_space<vmem>>, %arg3: memref<8x128xf32, #tpu.memory_space<vmem>>) attributes {dimension_semantics = [#tpu.dimension_semantics<parallel>], iteration_bounds = array<i64: 1>, scalar_prefetch = 0 : i64, scratch_operands = 0 : i64, tpu.core_type = #tpu.core_type<tc>, window_params = [{transform_indices = @transform_0, window_bounds = array<i64: 8, 2>}, {pipeline_mode = #tpu.pipeline_mode<synchronous>, transform_indices = @transform_1, window_bounds = array<i64: 32, 128>}, {transform_indices = @transform_2, window_bounds = array<i64: 8, 128>}]} {
    %c0 = arith.constant 0 : index
    %c0_0 = arith.constant 0 : index
    %0 = vector.load %arg1[%c0, %c0_0] : memref<8x2xi32, #tpu.memory_space<vmem>>, vector<8x2xi32>
    %1 = tpu.iota {dimensions = array<i32: 1>} : vector<8x32xi32>
    %2 = vector.extract_strided_slice %0 {offsets = [0, 0], sizes = [8, 1], strides = [1, 1]} : vector<8x2xi32> to vector<8x1xi32>
    %3 = vector.broadcast %2 : vector<8x1xi32> to vector<8x32xi32>
    %4 = arith.cmpi eq, %1, %3 : vector<8x32xi32>
    %5 = vector.extract_strided_slice %0 {offsets = [0, 1], sizes = [8, 1], strides = [1, 1]} : vector<8x2xi32> to vector<8x1xi32>
    %6 = vector.broadcast %5 : vector<8x1xi32> to vector<8x32xi32>
    %7 = arith.cmpi eq, %1, %6 : vector<8x32xi32>
    %8 = arith.ori %4, %7 : vector<8x32xi1>
    %9 = arith.extui %8 : vector<8x32xi1> to vector<8x32xi32>
    %10 = arith.sitofp %9 : vector<8x32xi32> to vector<8x32xf32>
    %c0_1 = arith.constant 0 : index
    %c0_2 = arith.constant 0 : index
    %11 = vector.load %arg2[%c0_1, %c0_2] : memref<32x128xf32, #tpu.memory_space<vmem>>, vector<32x128xf32>
    %cst = arith.constant dense<0.000000e+00> : vector<8x128xf32>
    %12 = tpu.matmul %10, %11, %cst {dimension_numbers = #tpu.dot_dimension_numbers<[1], [0], [0], [1], [0, 0, 1, 1], [], []>} : vector<8x32xf32>, vector<32x128xf32>, vector<8x128xf32> -> vector<8x128xf32>
    %c0_3 = arith.constant 0 : index
    %c0_4 = arith.constant 0 : index
    %13 = vector.load %arg3[%c0_3, %c0_4] : memref<8x128xf32, #tpu.memory_space<vmem>>, vector<8x128xf32>
    tpu.vector_store %arg3[%c0_3, %c0_4], %12 {strides = array<i32>} : memref<8x128xf32, #tpu.memory_space<vmem>>, vector<8x128xf32>,
    return
  }
  func.func @transform_0(%arg0: i32) -> (i32, i32) {
    %c0_i32 = arith.constant 0 : i32
    %c0_i32_0 = arith.constant 0 : i32
    return %arg0, %c0_i32 : i32, i32
  }
  func.func @transform_1(%arg0: i32) -> (i32, i32) {
    %c0_i32 = arith.constant 0 : i32
    %c0_i32_0 = arith.constant 0 : i32
    %c0_i32_1 = arith.constant 0 : i32
    return %c0_i32, %c0_i32_0 : i32, i32
  }
  func.func @transform_2(%arg0: i32) -> (i32, i32) {
    %c0_i32 = arith.constant 0 : i32
    %c0_i32_0 = arith.constant 0 : i32
    return %arg0, %c0_i32 : i32, i32
  }
}

</mosaic_0001>

<bundles_post_ra>
// kernel: tpu_custom_call.1
= control target key start
LH: loop header
LB: loop body
LE: loop exit
PB: predicated region body
PF: predicated region fallthrough
CT: control target
= control target key end

     0   :  { %7 = vsyncpa [#allocation3], 0  ;;  %s238_s0 = inlined_call_operand.vmem [shape: s32[8,2], index: 0, kind: input, shape index: {}]   ;;  %s239_s1 = inlined_call_operand.hbm [shape: f32[32,128], index: 1, kind: input, shape index: {}]   ;;  %s240_s2 = inlined_call_operand.hbm [shape: f32[8,128], index: 2, kind: output, shape index: {}]  }
   0x1   :  { %8 = vsyncpa [#allocation4], 0  ;;  %s206_s9 = smov [#allocation2]  }
   0x2   :  { %s16_s10 = sshll.u32 %s206_s9, 4  ;;  %s17_s10 = int_to_ptr.vmem [resolvable:$true] %s16_s10 }
   0x3   :  { %s170_s11 = scalar_lea.vmem %s17_s10, 512  ;;  %p175_p1 = scmp.lt.s32.totalorder %s17_s10, %s17_s10 }
   0x4   :  { %p171_p0 = scmp.ne.s32.totalorder %s17_s10, %s170_s11  ;;  %p176_p2 = scmp.lt.s32.totalorder %s170_s11, %s170_s11 }
   0x6   :  { %p177_p3 = por %p176_p2, %p175_p1 }
   0x8   :  { %p178_p4 = pnand %p177_p3, %p171_p0 }
   0xa   :  { %181 = shalt.err (!%p178_p4)
}
   0xb   :  { %s207_s12 = smov 128   ;;  %s208_s13 = smov 8  }
   0xc   :  { %22 = dma.hbm_to_vmem [thread:$0]  %s239_s1, 512, %s17_s10, [#allocation3], %s207_s12, %s207_s12, %s208_s13  }
   0xd   :  { %202 = dma.done.wait [#allocation3], 512  }
   0xe   :  { %203 = vsyncadd [#allocation3], 4294966784  ;;  %v209_v0 = vmov 0   ;;  %v210_v1 = vmov 0.0   ;;  %v26_v2 = vld [vmem:[%s238_s0] sm:$0xff]  ;;  %v43_v3 = vld [vmem:[#allocation2 + $0x18] sm:$0xff]  ;;  %v27_v8 = vlaneseq }
   0xf   :  { %160 = vset.pattern.permute.xlu0 %v209_v0  ;;  %141 = vmatprep.subr.mxu0 %v210_v1  ;;  %v42_v4 = vld [vmem:[#allocation2 + $0x10] sm:$0xff]  ;;  %v41_v5 = vld [vmem:[#allocation2 + $0x8] sm:$0xff]  ;;  %v40_v6 = vld [vmem:[#allocation2] sm:$0xff]  ;;  %vm211_vm0 = vmmov 0   ;;  %v212_v7 = vmov 1   ;;  %vm44_vm3 = vcmask 261120  }
  0x10   :  { %30 = vperm.xlu0 %160, %v26_v2   ;;  %142 = vmatpush3.msra.mxu0 %v43_v3  ;;  %v28_v10 = vand.u32 127, %v27_v8  ;;  %s213_s0 = smov [#allocation5]  }
  0x11   :  { %143 = vmatprep.subr.mxu0 %v210_v1  ;;  %149 = vmatprep.mubr.msk.f32.mxu0 %vm211_vm0, %v210_v1  ;;  %s125_s1 = sshll.u32 %s213_s0, 4  ;;  %s126_s1 = int_to_ptr.vmem [resolvable:$true] %s125_s1 }
  0x12   :  { %144 = vmatpush3.msra.mxu0 %v42_v4  ;;  %s182_s18 = scalar_lea.vmem %s126_s1, 128  ;;  %p187_p6 = scmp.lt.s32.totalorder %s126_s1, %s126_s1 }
  0x13   :  { %145 = vmatprep.subr.mxu0 %v210_v1  ;;  %p183_p5 = scmp.ne.s32.totalorder %s126_s1, %s182_s18  ;;  %p188_p7 = scmp.lt.s32.totalorder %s182_s18, %s182_s18 }
  0x14   :  { %161 = vset.pattern.permute.xlu0 %v212_v7  ;;  %146 = vmatpush3.msra.mxu0 %v41_v5 }
  0x15   :  { %34 = vperm.xlu0 %161, %v26_v2   ;;  %147 = vmatprep.subr.mxu0 %v210_v1  ;;  %p189_p8 = por %p188_p7, %p187_p6 }
  0x16   :  { %148 = vmatpush3.msra.mxu0 %v40_v6 }
  0x17   :  { %p190_p9 = pnand %p189_p8, %p183_p5 }
  0x8b   :  { %v31_v9 = vpop.permute.xlu0 %30 }
  0x8c   :  { %vm32_vm1 = vcmp.eq.s32.totalorder %v28_v10, %v31_v9 }
  0x90   :  { %v35_v11 = vpop.permute.xlu0 %34 }
  0x91   :  { %vm36_vm2 = vcmp.eq.s32.totalorder %v28_v10, %v35_v11 }
  0x92   :  { %vm37_vm4 = vmor %vm32_vm1, %vm36_vm2 }
  0x93   :  { %v134_v12 = vsel %vm37_vm4, 1.0, %v210_v1 }
  0x94   :  { %150 = vmatmul.mubr.msk.f32.vlgmr.msra.gmra.mxu0 %vm44_vm3, %v134_v12 }
 0x154   :  { %v114_v13 = vpop.f32.mrf.mxu0 }
 0x155   :  { %118 = vst [vmem:[#allocation5] sm:$0xff] %v114_v13 }
 0x156   :  { %v151_v14 = vpop.f32.mrf.mxu0 }
 0x157   :  { %193 = shalt.err (!%p190_p9)
}
 0x158   :  { %128 = dma.vmem_to_hbm [thread:$0]  %s126_s1, 128, %s240_s2, [#allocation4]  }
 0x159   :  { %204 = dma.done.wait [#allocation4], 128  }
 0x15a   :  { %205 = vsyncadd [#allocation4], 4294967168 }
 0x15b   :  { %132 = vsyncpa [#allocation3], 1 }
 0x15c   :  { %133 = vsyncpa [#allocation4], 1 }

</bundles_post_ra>
